<compile_context>
chip_gen: v7x
topology: tpu7x:2x2x1
jax: 0.10.0
libtpu: 0.0.40
codegen_flags: <defaults>
</compile_context>

<pallas_src>
import math

import jax
import jax.numpy as jnp
from jax.experimental import pallas as pl
from jax.experimental.pallas import tpu as pltpu


def _round_up(x, m):
    return (x + m - 1) // m * m


def _vmem_capacity_bytes():
    """Physical VMEM per core; conservative fallback if not queryable."""
    try:
        return int(pltpu.get_tpu_info().vmem_capacity_bytes)
    except Exception:
        return 64 * 1024 * 1024  # v7x per-TensorCore VMEM (smallest generation)


def gc_conv1d(x, weight, *, row_tile=None):
    """Valid 1D cross-correlation of x (B, C, L) with weight (1, 1, K)."""
    B, C, L = x.shape
    K = weight.shape[-1]
    if L < K:
        raise ValueError(f"sequence length {L} must be >= kernel size {K}")
    Lout = L - K + 1
    R = B * C

    x2 = x.reshape(R, L)                       # no padding, no extra copy
    w1 = weight.reshape(K).astype(jnp.float32)  # K taps -> SMEM scalars

    itemsize = jnp.dtype(x.dtype).itemsize
    # dtype-aware sublane packing: 8 rows for f32, 16 for bf16, 32 for int8.
    sub = max(8, 32 // itemsize)

    cap = _vmem_capacity_bytes()
    # Generation-aware budget: ~42 MiB on v5e/v6e (128 MiB VMEM), ~21 MiB on
    # v7x (64 MiB VMEM) -- leaves headroom for double buffering + temporaries.
    budget = min(cap // 3, 56 * 1024 * 1024)
    # Per-row VMEM bytes: double-buffered input + output blocks plus roughly
    # three f32 temporaries (upcast block, shifted slice, accumulator).
    bytes_per_row = 2 * L * itemsize + 2 * Lout * itemsize + 3 * L * 4

    if row_tile is None:
        tr_cap = max(sub, (budget // bytes_per_row) // sub * sub)
        # Keep >= 2 grid steps whenever R allows it, so the "parallel" row
        # axis can be sharded across v7x's two TensorCores.
        half = _round_up(max(1, (R + 1) // 2), sub)
        row_tile = min(tr_cap, half)
    TR = max(sub, _round_up(int(row_tile), sub))
    TR = min(TR, _round_up(R, sub))
    if TR > R:
        TR = R  # full-row block: legal even when R isn't sublane-aligned
    grid_r = pl.cdiv(R, TR)

    # Tell the compiler the budget we actually sized against.
    vmem_limit = int(min(max(32 * 1024 * 1024, 2 * TR * bytes_per_row),
                         cap - 8 * 1024 * 1024))

    def kernel(w_ref, x_ref, o_ref):
        # w_ref: SMEM (K,) scalar taps; x_ref: VMEM (TR, L); o_ref: (TR, Lout).
        xv = x_ref[...].astype(jnp.float32)
        # K static value slices (lane shifts of already-loaded vregs) with
        # scalar-broadcast FMAs; K is small & static -> fully unrolled.
        acc = w_ref[0] * xv[:, :Lout]
        for k in range(1, K):
            acc = acc + w_ref[k] * xv[:, k:k + Lout]
        # Store exactly the valid Lout columns: no garbage lanes to slice off
        # in the wrapper, so the kernel output is the final result.
        o_ref[...] = acc.astype(o_ref.dtype)

    out = pl.pallas_call(
        kernel,
        out_shape=jax.ShapeDtypeStruct((R, Lout), x.dtype),
        grid=(grid_r,),
        in_specs=[
            pl.BlockSpec(memory_space=pltpu.MemorySpace.SMEM),  # K taps
            pl.BlockSpec((TR, L), lambda i: (i, 0)),            # input rows
        ],
        out_specs=pl.BlockSpec((TR, Lout), lambda i: (i, 0)),
        compiler_params=pltpu.CompilerParams(
            dimension_semantics=("parallel",),
            vmem_limit_bytes=vmem_limit,
        ),
    )(w1, x2)

    return out.reshape(B, C, Lout)


def init_gc_weight(key, kernel_size, dtype=jnp.float32):
    """Matches torch.nn.init.kaiming_uniform_(w, a=sqrt(5)) for w of shape (1,1,K)."""
    fan_in = kernel_size  # in_channels(=1) * receptive_field(=K)
    gain = math.sqrt(2.0 / (1.0 + 5.0))  # a = sqrt(5)
    bound = gain * math.sqrt(3.0 / fan_in)
    return jax.random.uniform(
        key, (1, 1, kernel_size), dtype=dtype, minval=-bound, maxval=bound
    )


def _reference(x, weight):
    K = weight.shape[-1]
    L = x.shape[-1]
    w = weight.reshape(K)
    return sum(w[k] * x[:, :, k:k + (L - K + 1)] for k in range(K))


if __name__ == "__main__":
    key = jax.random.PRNGKey(0)
    kx, kw, kx2, kw2 = jax.random.split(key, 4)

    # Small shape consistent with the module's forward: (B, C, L), K taps.
    B, C, L, K = 2, 4, 16, 3
    x = jax.random.normal(kx, (B, C, L), dtype=jnp.float32)
    weight = init_gc_weight(kw, K)
    out = jax.block_until_ready(gc_conv1d(x, weight))
    assert out.shape == (B, C, L - K + 1), out.shape
    assert jnp.allclose(out, _reference(x, weight), atol=1e-5, rtol=1e-5)

    # Second check: multiple row tiles (grid > 1) and L not a multiple of 128.
    B2, C2, L2, K2 = 3, 8, 200, 5
    x2 = jax.random.normal(kx2, (B2, C2, L2), dtype=jnp.float32)
    w2 = init_gc_weight(kw2, K2)
    out2 = jax.block_until_ready(gc_conv1d(x2, w2, row_tile=8))
    assert out2.shape == (B2, C2, L2 - K2 + 1), out2.shape
    assert jnp.allclose(out2, _reference(x2, w2), atol=1e-5, rtol=1e-5)

    print("KERNEL_OK")
</pallas_src>

<mosaic_0001>
module attributes {stable_mosaic.version = 11 : i64} {
  func.func @kernel(%arg0: i32, %arg1: memref<3xf32, #tpu.memory_space<smem>>, %arg2: memref<8x16xf32, #tpu.memory_space<vmem>>, %arg3: memref<8x14xf32, #tpu.memory_space<vmem>>) attributes {dimension_semantics = [#tpu.dimension_semantics<parallel>], iteration_bounds = array<i64: 1>, scalar_prefetch = 0 : i64, scratch_operands = 0 : i64, tpu.core_type = #tpu.core_type<tc>, window_params = [{transform_indices = @transform_0, window_bounds = array<i64: 3>}, {transform_indices = @transform_1, window_bounds = array<i64: 8, 16>}, {transform_indices = @transform_2, window_bounds = array<i64: 8, 14>}]} {
    %c0 = arith.constant 0 : index
    %c0_0 = arith.constant 0 : index
    %0 = vector.load %arg2[%c0, %c0_0] : memref<8x16xf32, #tpu.memory_space<vmem>>, vector<8x16xf32>
    %c0_1 = arith.constant 0 : index
    %1 = memref.load %arg1[%c0_1] : memref<3xf32, #tpu.memory_space<smem>>
    %2 = vector.extract_strided_slice %0 {offsets = [0, 0], sizes = [8, 14], strides = [1, 1]} : vector<8x16xf32> to vector<8x14xf32>
    %3 = vector.broadcast %1 : f32 to vector<8x14xf32>
    %4 = arith.mulf %3, %2 : vector<8x14xf32>
    %c1 = arith.constant 1 : index
    %5 = memref.load %arg1[%c1] : memref<3xf32, #tpu.memory_space<smem>>
    %6 = vector.extract_strided_slice %0 {offsets = [0, 1], sizes = [8, 14], strides = [1, 1]} : vector<8x16xf32> to vector<8x14xf32>
    %7 = vector.broadcast %5 : f32 to vector<8x14xf32>
    %8 = arith.mulf %7, %6 : vector<8x14xf32>
    %9 = arith.addf %4, %8 : vector<8x14xf32>
    %c2 = arith.constant 2 : index
    %10 = memref.load %arg1[%c2] : memref<3xf32, #tpu.memory_space<smem>>
    %11 = vector.extract_strided_slice %0 {offsets = [0, 2], sizes = [8, 14], strides = [1, 1]} : vector<8x16xf32> to vector<8x14xf32>
    %12 = vector.broadcast %10 : f32 to vector<8x14xf32>
    %13 = arith.mulf %12, %11 : vector<8x14xf32>
    %14 = arith.addf %9, %13 : vector<8x14xf32>
    %c0_2 = arith.constant 0 : index
    %c0_3 = arith.constant 0 : index
    %15 = vector.load %arg3[%c0_2, %c0_3] : memref<8x14xf32, #tpu.memory_space<vmem>>, vector<8x14xf32>
    tpu.vector_store %arg3[%c0_2, %c0_3], %14 {strides = array<i32>} : memref<8x14xf32, #tpu.memory_space<vmem>>, vector<8x14xf32>,
    return
  }
  func.func @transform_0(%arg0: i32) -> i32 {
    %c0_i32 = arith.constant 0 : i32
    %c0_i32_0 = arith.constant 0 : i32
    return %c0_i32 : i32
  }
  func.func @transform_1(%arg0: i32) -> (i32, i32) {
    %c0_i32 = arith.constant 0 : i32
    %c0_i32_0 = arith.constant 0 : i32
    return %arg0, %c0_i32 : i32, i32
  }
  func.func @transform_2(%arg0: i32) -> (i32, i32) {
    %c0_i32 = arith.constant 0 : i32
    %c0_i32_0 = arith.constant 0 : i32
    return %arg0, %c0_i32 : i32, i32
  }
}

</mosaic_0001>

<bundles_post_ra>
// kernel: tpu_custom_call.1
= control target key start
LH: loop header
LB: loop body
LE: loop exit
PB: predicated region body
PF: predicated region fallthrough
CT: control target
= control target key end

     0   :  { %7 = vsyncpa [#allocation5], 0  ;;  %s196_s0 = inlined_call_operand.hbm [shape: f32[3], index: 0, kind: input, shape index: {}]   ;;  %s197_s1 = inlined_call_operand.hbm [shape: f32[8,16], index: 1, kind: input, shape index: {}]   ;;  %s198_s2 = inlined_call_operand.hbm [shape: f32[8,14], index: 2, kind: output, shape index: {}]  }
   0x1   :  { %8 = vsyncpa [#allocation3], 0 }
   0x2   :  { %9 = vsyncpa [#allocation4], 0  ;;  %s80_s11 = scalar_lea.hbm %s196_s0, 16 }
   0x3   :  { %p81_p0 = scmp.ne.s32.totalorder %s196_s0, %s80_s11  ;;  %p84_p1 = scmp.lt.u32.totalorder %s80_s11, %s196_s0 }
   0x5   :  { %p86_p2 = pnand %p84_p1, %p81_p0 }
   0x7   :  { %89 = shalt.err (!%p86_p2)
}
   0x8   :  { %s140_s16 = smov [#allocation2]   ;;  %s141_s19 = smov [#allocation6]  }
   0x9   :  { %17 = dma.hbm_to_smem %s196_s0, 16, %s140_s16, [#allocation5]  }
   0xa   :  { %s24_s20 = sshll.u32 %s141_s19, 4  ;;  %s90_s23 = scalar_lea.hbm %s197_s1, 128  ;;  %s25_s20 = int_to_ptr.vmem [resolvable:$true] %s24_s20 }
   0xb   :  { %p91_p3 = scmp.ne.s32.totalorder %s197_s1, %s90_s23  ;;  %p94_p4 = scmp.lt.u32.totalorder %s90_s23, %s197_s1 }
   0xd   :  { %p96_p5 = pnand %p94_p4, %p91_p3 }
   0xf   :  { %99 = shalt.err (!%p96_p5)
}
  0x10   :  { %s100_s28 = scalar_lea.vmem %s25_s20, 128  ;;  %p105_p7 = scmp.lt.s32.totalorder %s25_s20, %s25_s20 }
  0x11   :  { %p101_p6 = scmp.ne.s32.totalorder %s25_s20, %s100_s28  ;;  %p106_p8 = scmp.lt.s32.totalorder %s100_s28, %s100_s28 }
  0x13   :  { %p107_p9 = por %p106_p8, %p105_p7 }
  0x15   :  { %p108_p10 = pnand %p107_p9, %p101_p6 }
  0x17   :  { %111 = shalt.err (!%p108_p10)
}
  0x18   :  { %27 = dma.hbm_to_vmem [thread:$0]  %s197_s1, 128, %s25_s20, [#allocation3]  }
  0x19   :  { %134 = dma.done.wait [#allocation5], 16  }
  0x1a   :  { %135 = vsyncadd [#allocation5], 4294967280 }
  0x1b   :  { %136 = dma.done.wait [#allocation3], 128  }
  0x1c   :  { %137 = vsyncadd [#allocation3], 4294967168 }
  0x1d   :  { %34 = sfence }
  0x1e   :  { %s73_s30 = sld [smem:[#allocation2 + $0x1]]  ;;  %s74_s3 = sld [smem:[#allocation2 + $0x2]]  ;;  %v35_v0 = vld [vmem:[#allocation6] sm:$0xff]  ;;  %vm55_vm0 = vcmask 113664  }
  0x1f   :  { %s142_s4 = smov 127   ;;  %s143_s5 = smov 126  }
  0x20   :  { %s36_s6 = sld [smem:[#allocation2]]  ;;  %s144_s1 = smov [#allocation7]  }
  0x21   :  { %s63_s7 = sshll.u32 %s144_s1, 4  ;;  %s64_s7 = int_to_ptr.vmem [resolvable:$true] %s63_s7 }
  0x22   :  { %s112_s8 = scalar_lea.vmem %s64_s7, 128  ;;  %p117_p12 = scmp.lt.s32.totalorder %s64_s7, %s64_s7 }
  0x23   :  { %p113_p11 = scmp.ne.s32.totalorder %s64_s7, %s112_s8  ;;  %p118_p13 = scmp.lt.s32.totalorder %s112_s8, %s112_s8 }
  0x24   :  { %v40_v1 = vstv %s73_s30  ;;  %v48_v3 = vstv %s74_s3 }
  0x25   :  { %v41_v2 = vmul.f32 %v40_v1, %v35_v0  ;;  %v49_v4 = vmul.f32 %v48_v3, %v35_v0  ;;  %p119_p0 = por %p118_p13, %p117_p12 }
  0x26   :  { %v37_v5 = vstv %s36_s6 }
  0x27   :  { %43 = vrot.lane.b32.xlu0 %v41_v2, %s142_s4  ;;  %v38_v6 = vmul.f32 %v37_v5, %v35_v0  ;;  %p120_p1 = pnand %p119_p0, %p113_p11 }
  0x2b   :  { %51 = vrot.lane.b32.xlu0 %v49_v4, %s143_s5 }
  0x99   :  { %v44_v7 = vpop.permute.xlu0 %43 }
  0x9a   :  { %v46_v8 = vadd.f32 %v44_v7, %v38_v6 }
  0x9d   :  { %v52_v9 = vpop.permute.xlu0 %51 }
  0x9e   :  { %v54_v10 = vadd.f32 %v52_v9, %v46_v8 }
  0xa0   :  { %56 = vst.msk [vmem:[#allocation7] sm:$0xff] %vm55_vm0, %v54_v10 }
  0xa1   :  { %123 = shalt.err (!%p120_p1)
}
  0xa2   :  { %s124_s11 = scalar_lea.hbm %s198_s2, 128 }
  0xa3   :  { %p125_p2 = scmp.ne.s32.totalorder %s198_s2, %s124_s11  ;;  %p128_p3 = scmp.lt.u32.totalorder %s124_s11, %s198_s2 }
  0xa5   :  { %p130_p4 = pnand %p128_p3, %p125_p2 }
  0xa7   :  { %133 = shalt.err (!%p130_p4)
}
  0xa8   :  { %66 = dma.vmem_to_hbm [thread:$0]  %s64_s7, 128, %s198_s2, [#allocation4]  }
  0xa9   :  { %138 = dma.done.wait [#allocation4], 128  }
  0xaa   :  { %139 = vsyncadd [#allocation4], 4294967168 }
  0xab   :  { %70 = vsyncpa [#allocation3], 1 }
  0xac   :  { %71 = vsyncpa [#allocation4], 1 }
  0xad   :  { %72 = vsyncpa [#allocation5], 1 }

</bundles_post_ra>
